<compile_context>
chip_gen: v7x
topology: tpu7x:2x2x1
jax: 0.10.0
libtpu: 0.0.40
codegen_flags: <defaults>
</compile_context>

<pallas_src>
import functools

import jax
import jax.numpy as jnp
from jax.experimental import pallas as pl
from jax.experimental.pallas import tpu as pltpu

KL_WEIGHT = 1.0

NUM_ROW_PARTITIONS = 2   # feeds both TensorCores on v7x; harmless on v5e/v6e
_OUT_LANES = 128         # lane-dense (unmasked) output stores
_ROW_ALIGN = 32          # row-tile granularity (covers f32/bf16/int8 tiling)


def _round_up(x, m):
    return (x + m - 1) // m * m


def _ce_partial_kernel(y_ref, logits_ref, out_ref, acc_ref):
    """Accumulates the sum of per-row cross entropies for one row partition."""
    i = pl.program_id(1)

    @pl.when(i == 0)
    def _init():
        acc_ref[...] = jnp.zeros_like(acc_ref)

    logits = logits_ref[...].astype(jnp.float32)      # (TN, C), cast after DMA
    y = y_ref[...]                                    # (TN, 1) int32, -1 = pad
    tn, c = logits.shape

    # Gather logits[row, y[row]] via lane-index compare + masked lane-sum.
    col = jax.lax.broadcasted_iota(jnp.int32, (tn, c), 1)
    picked = jnp.sum(jnp.where(col == y, logits, 0.0), axis=-1, keepdims=True)

    # Numerically-stable log-sum-exp per row.
    m = jnp.max(logits, axis=-1, keepdims=True)
    lse = m + jnp.log(jnp.sum(jnp.exp(logits - m), axis=-1, keepdims=True))

    # Per-row CE accumulated in a column vector; padded rows (y < 0) masked.
    valid = y >= 0
    acc_ref[...] += jnp.where(valid, lse - picked, 0.0)

    @pl.when(i == pl.num_programs(1) - 1)
    def _finalize():
        # Single cross-sublane reduce per partition, broadcast across all 128
        # lanes so the output store is lane-dense (unmasked vst).
        out_ref[...] = jnp.broadcast_to(
            jnp.sum(acc_ref[...], keepdims=True), out_ref.shape)


@functools.partial(jax.jit, static_argnames=("tile_n",))
def vae_loss(y, logits, kl_loss, *, tile_n=512):
    """y: int targets (...,), logits: (..., C) any float dtype, kl_loss: scalar."""
    c = logits.shape[-1]
    logits2d = logits.reshape(-1, c)              # keep native dtype (bf16 ok)
    y2d = y.reshape(-1, 1).astype(jnp.int32)
    n = logits2d.shape[0]
    itemsize = jnp.dtype(logits2d.dtype).itemsize

    # Row tile: multiple of 32 sublanes, capped so one logits tile is <= 8 MiB
    # (x2 double-buffered = 16 MiB, within the scoped-VMEM default everywhere).
    rows_by_vmem = max(_ROW_ALIGN,
                       ((8 * 1024 * 1024) // (c * itemsize))
                       // _ROW_ALIGN * _ROW_ALIGN)
    tn = min(_round_up(tile_n, _ROW_ALIGN), rows_by_vmem, _round_up(n, _ROW_ALIGN))

    # Pad rows so both partitions get whole tiles; padded targets are -1.
    n_pad = _round_up(n, NUM_ROW_PARTITIONS * tn)
    if n_pad != n:
        logits2d = jnp.pad(logits2d, ((0, n_pad - n), (0, 0)))
        y2d = jnp.pad(y2d, ((0, n_pad - n), (0, 0)), constant_values=-1)
    blocks_per_part = n_pad // (NUM_ROW_PARTITIONS * tn)

    partials = pl.pallas_call(
        _ce_partial_kernel,
        out_shape=jax.ShapeDtypeStruct((1, NUM_ROW_PARTITIONS * _OUT_LANES),
                                       jnp.float32),
        grid_spec=pltpu.PrefetchScalarGridSpec(
            num_scalar_prefetch=0,
            grid=(NUM_ROW_PARTITIONS, blocks_per_part),
            in_specs=[
                pl.BlockSpec((tn, 1), lambda p, i: (p * blocks_per_part + i, 0)),
                pl.BlockSpec((tn, c), lambda p, i: (p * blocks_per_part + i, 0)),
            ],
            out_specs=pl.BlockSpec((1, _OUT_LANES), lambda p, i: (0, p)),
            scratch_shapes=[pltpu.VMEM((tn, 1), jnp.float32)],
        ),
        compiler_params=pltpu.CompilerParams(
            dimension_semantics=("parallel", "arbitrary")),
    )(y2d, logits2d)

    # Combine the per-core partial CE sums; divide by the TRUE row count.
    ce_sum = jnp.sum(partials.reshape(NUM_ROW_PARTITIONS, _OUT_LANES)[:, 0])
    recon = ce_sum / jnp.asarray(n, jnp.float32)
    return KL_WEIGHT * jnp.asarray(kl_loss, jnp.float32) + recon


def _vae_loss_ref(y, logits, kl_loss):
    c = logits.shape[-1]
    lg = logits.reshape(-1, c).astype(jnp.float32)
    yf = y.reshape(-1).astype(jnp.int32)
    lse = jax.scipy.special.logsumexp(lg, axis=-1)
    picked = jnp.take_along_axis(lg, yf[:, None], axis=-1)[:, 0]
    recon = jnp.mean(lse - picked)
    return KL_WEIGHT * jnp.asarray(kl_loss, jnp.float32) + recon


if __name__ == "__main__":
    # Case 1: small shapes matching the grammar-VAE decoder output (f32).
    k1, k2, k3 = jax.random.split(jax.random.PRNGKey(0), 3)
    batch, seq, vocab = 2, 8, 32                  # N = 16 rows
    logits = jax.random.normal(k1, (batch, seq, vocab), dtype=jnp.float32)
    y = jax.random.randint(k2, (batch, seq), 0, vocab, dtype=jnp.int32)
    kl_loss = jnp.abs(jax.random.normal(k3, (), dtype=jnp.float32))

    out = vae_loss(y, logits, kl_loss)
    jax.block_until_ready(out)
    ref = _vae_loss_ref(y, logits, kl_loss)
    assert jnp.allclose(out, ref, rtol=1e-5, atol=1e-5), (out, ref)

    # Case 2: row count not a multiple of the tile (exercises padding/masking)
    # with bf16 logits DMA'd in native dtype and cast to f32 inside the kernel.
    k4, k5, k6 = jax.random.split(jax.random.PRNGKey(1), 3)
    batch2, seq2, vocab2 = 3, 50, 48              # N = 150 rows
    logits2 = jax.random.normal(
        k4, (batch2, seq2, vocab2), dtype=jnp.float32).astype(jnp.bfloat16)
    y2 = jax.random.randint(k5, (batch2, seq2), 0, vocab2, dtype=jnp.int32)
    kl2 = jnp.abs(jax.random.normal(k6, (), dtype=jnp.float32))

    out2 = vae_loss(y2, logits2, kl2)
    jax.block_until_ready(out2)
    ref2 = _vae_loss_ref(y2, logits2, kl2)
    assert jnp.allclose(out2, ref2, rtol=1e-4, atol=1e-4), (out2, ref2)

    print("KERNEL_OK")
</pallas_src>

<mosaic_0001>
module attributes {stable_mosaic.version = 11 : i64} {
  func.func @_ce_partial_kernel(%arg0: i32, %arg1: i32, %arg2: memref<32x1xi32, #tpu.memory_space<vmem>>, %arg3: memref<32x32xf32, #tpu.memory_space<vmem>>, %arg4: memref<1x128xf32, #tpu.memory_space<vmem>>, %arg5: memref<32x1xf32, #tpu.memory_space<vmem>>) attributes {dimension_semantics = [#tpu.dimension_semantics<parallel>, #tpu.dimension_semantics<arbitrary>], iteration_bounds = array<i64: 2, 1>, scalar_prefetch = 0 : i64, scratch_operands = 1 : i64, tpu.core_type = #tpu.core_type<tc>, window_params = [{transform_indices = @transform_0, window_bounds = array<i64: 32, 1>}, {transform_indices = @transform_1, window_bounds = array<i64: 32, 32>}, {transform_indices = @transform_2, window_bounds = array<i64: 1, 128>}]} {
    %c0_i32 = arith.constant 0 : i32
    %0 = arith.cmpi eq, %arg1, %c0_i32 : i32
    %1 = arith.extui %0 : i1 to i32
    %c0_i32_0 = arith.constant 0 : i32
    %2 = arith.cmpi ne, %1, %c0_i32_0 : i32
    scf.if %2 {
      %cst_15 = arith.constant 0.000000e+00 : f32
      %32 = vector.broadcast %cst_15 : f32 to vector<32x1xf32>
      %c0_16 = arith.constant 0 : index
      %c0_17 = arith.constant 0 : index
      %33 = vector.load %arg5[%c0_16, %c0_17] : memref<32x1xf32, #tpu.memory_space<vmem>>, vector<32x1xf32>
      tpu.vector_store %arg5[%c0_16, %c0_17], %32 {strides = array<i32>} : memref<32x1xf32, #tpu.memory_space<vmem>>, vector<32x1xf32>,
    } else {
    }
    %c0 = arith.constant 0 : index
    %c0_1 = arith.constant 0 : index
    %3 = vector.load %arg3[%c0, %c0_1] : memref<32x32xf32, #tpu.memory_space<vmem>>, vector<32x32xf32>
    %c0_2 = arith.constant 0 : index
    %c0_3 = arith.constant 0 : index
    %4 = vector.load %arg2[%c0_2, %c0_3] : memref<32x1xi32, #tpu.memory_space<vmem>>, vector<32x1xi32>
    %5 = tpu.iota {dimensions = array<i32: 1>} : vector<32x32xi32>
    %6 = vector.broadcast %4 : vector<32x1xi32> to vector<32x32xi32>
    %7 = arith.cmpi eq, %5, %6 : vector<32x32xi32>
    %cst = arith.constant 0.000000e+00 : f32
    %8 = vector.broadcast %cst : f32 to vector<32x32xf32>
    %9 = arith.select %7, %3, %8 : vector<32x32xi1>, vector<32x32xf32>
    %cst_4 = arith.constant dense<0.000000e+00> : vector<32xf32>
    %10 = vector.multi_reduction <add>, %9, %cst_4 [1] : vector<32x32xf32> to vector<32xf32>
    %11 = vector.shape_cast %10 : vector<32xf32> to vector<32x1xf32>
    %cst_5 = arith.constant dense<0xFF800000> : vector<32xf32>
    %12 = vector.multi_reduction <maximumf>, %3, %cst_5 [1] : vector<32x32xf32> to vector<32xf32>
    %13 = vector.shape_cast %12 : vector<32xf32> to vector<32x1xf32>
    %14 = vector.broadcast %13 : vector<32x1xf32> to vector<32x32xf32>
    %15 = arith.subf %3, %14 : vector<32x32xf32>
    %16 = math.exp %15 : vector<32x32xf32>
    %cst_6 = arith.constant dense<0.000000e+00> : vector<32xf32>
    %17 = vector.multi_reduction <add>, %16, %cst_6 [1] : vector<32x32xf32> to vector<32xf32>
    %18 = vector.shape_cast %17 : vector<32xf32> to vector<32x1xf32>
    %19 = math.log %18 : vector<32x1xf32>
    %20 = arith.addf %13, %19 : vector<32x1xf32>
    %c0_i32_7 = arith.constant 0 : i32
    %21 = vector.broadcast %c0_i32_7 : i32 to vector<32x1xi32>
    %22 = arith.cmpi sge, %4, %21 : vector<32x1xi32>
    %c0_8 = arith.constant 0 : index
    %c0_9 = arith.constant 0 : index
    %23 = vector.load %arg5[%c0_8, %c0_9] : memref<32x1xf32, #tpu.memory_space<vmem>>, vector<32x1xf32>
    %24 = arith.subf %20, %11 : vector<32x1xf32>
    %cst_10 = arith.constant 0.000000e+00 : f32
    %25 = vector.broadcast %cst_10 : f32 to vector<32x1xf32>
    %26 = arith.select %22, %24, %25 : vector<32x1xi1>, vector<32x1xf32>
    %27 = arith.addf %23, %26 : vector<32x1xf32>
    %c0_11 = arith.constant 0 : index
    %c0_12 = arith.constant 0 : index
    %28 = vector.load %arg5[%c0_11, %c0_12] : memref<32x1xf32, #tpu.memory_space<vmem>>, vector<32x1xf32>
    tpu.vector_store %arg5[%c0_11, %c0_12], %27 {strides = array<i32>} : memref<32x1xf32, #tpu.memory_space<vmem>>, vector<32x1xf32>,
    %c0_i32_13 = arith.constant 0 : i32
    %29 = arith.cmpi eq, %arg1, %c0_i32_13 : i32
    %30 = arith.extui %29 : i1 to i32
    %c0_i32_14 = arith.constant 0 : i32
    %31 = arith.cmpi ne, %30, %c0_i32_14 : i32
    scf.if %31 {
      %c0_15 = arith.constant 0 : index
      %c0_16 = arith.constant 0 : index
      %32 = vector.load %arg5[%c0_15, %c0_16] : memref<32x1xf32, #tpu.memory_space<vmem>>, vector<32x1xf32>
      %33 = vector.shape_cast %32 : vector<32x1xf32> to vector<1x32x1xf32>
      %cst_17 = arith.constant dense<0.000000e+00> : vector<1xf32>
      %34 = vector.multi_reduction <add>, %33, %cst_17 [1, 2] : vector<1x32x1xf32> to vector<1xf32>
      %35 = vector.shape_cast %34 : vector<1xf32> to vector<1x1x1xf32>
      %36 = vector.extract %35[0, 0, 0] : f32 from vector<1x1x1xf32>
      %37 = vector.broadcast %36 : f32 to vector<1x1xf32>
      %38 = vector.shape_cast %37 : vector<1x1xf32> to vector<1x1xf32>
      %39 = vector.broadcast %38 : vector<1x1xf32> to vector<1x128xf32>
      %c0_18 = arith.constant 0 : index
      %c0_19 = arith.constant 0 : index
      %40 = vector.load %arg4[%c0_18, %c0_19] : memref<1x128xf32, #tpu.memory_space<vmem>>, vector<1x128xf32>
      tpu.vector_store %arg4[%c0_18, %c0_19], %39 {strides = array<i32>} : memref<1x128xf32, #tpu.memory_space<vmem>>, vector<1x128xf32>,
    } else {
    }
    return
  }
  func.func @transform_0(%arg0: i32, %arg1: i32) -> (i32, i32) {
    %c1_i32 = arith.constant 1 : i32
    %0 = arith.muli %arg0, %c1_i32 : i32
    %1 = arith.addi %0, %arg1 : i32
    %c0_i32 = arith.constant 0 : i32
    %c0_i32_0 = arith.constant 0 : i32
    return %1, %c0_i32 : i32, i32
  }
  func.func @transform_1(%arg0: i32, %arg1: i32) -> (i32, i32) {
    %c1_i32 = arith.constant 1 : i32
    %0 = arith.muli %arg0, %c1_i32 : i32
    %1 = arith.addi %0, %arg1 : i32
    %c0_i32 = arith.constant 0 : i32
    %c0_i32_0 = arith.constant 0 : i32
    return %1, %c0_i32 : i32, i32
  }
  func.func @transform_2(%arg0: i32, %arg1: i32) -> (i32, i32) {
    %c0_i32 = arith.constant 0 : i32
    %c0_i32_0 = arith.constant 0 : i32
    return %c0_i32, %arg0 : i32, i32
  }
}

</mosaic_0001>

<bundles_post_ra>
// kernel: vae_loss.1
= control target key start
LH: loop header
LB: loop body
LE: loop exit
PB: predicated region body
PF: predicated region fallthrough
CT: control target
= control target key end

     0   :  { %s505_s9 = smov 0   ;;  %s507_s10 = smov 0   ;;  %s607_s0 = inlined_call_operand.vmem [shape: s32[64,1], index: 0, kind: input, shape index: {}]   ;;  %s608_s1 = inlined_call_operand.vmem [shape: f32[64,32], index: 1, kind: input, shape index: {}]   ;;  %s609_s2 = inlined_call_operand.vmem [shape: f32[1,256], index: 2, kind: output, shape index: {}]  }
   0x1   :  { %s509_s11 = smov 0  }
   0x2 LB: > { %s24_s12 = sadd.s32 1, %s482_s10  ;;  %p411_p0 = scmp.ge.s32.totalorder %s486_s11, 1  ;;  %s486_s11 = sphi %s509_s11, %s12_s11   ;;  %s482_s10 = sphi %s507_s10, %s611_s10   ;;  %s478_s9 = sphi %s505_s9, %s610_s9  }
   0x3   : > { %p26_p1 = scmp.ge.s32.totalorder %s24_s12, 2  ;;  %p144_p2 = scmp.lt.s32.totalorder %s486_s11, 3 }
   0x5   : > { %s613_s12 = smov (%p26_p1, %s24_s12), 0  ;;  %p145_p3 = pnand %p411_p0, %p144_p2 }
   0x6   : > { %s412_s13 = sshll.u32 (!%p145_p3), %s478_s9, 2  ;;  %v488_v0 = vmov (!%p145_p3), 0   ;;  %vm229_vm0 = vcmask (!%p145_p3), 261120   ;;  %v207_v26 = vlaneseq (!%p145_p3)  ;;  %vm194_vm5 = vcmask (!%p145_p3), 7168   ;;  %p187_p5 = scmp.lt.s32.totalorder (!%p145_p3), %s478_s9, 1 }
   0x7   : > { %148 = sbr.rel (%p145_p3) target bundleno = 565 (0x235), region = 28  ;;  %p173_p4 = scmp.lt.s32.totalorder (!%p145_p3), %s412_s13, 7  ;;  %447 = vset.pattern.permute.xlu1 (!%p145_p3), %v488_v0  ;;  %446 = vset.pattern.permute.xlu0 (!%p145_p3), %v488_v0  ;;  %v489_v47 = vmov (!%p145_p3), 0.0  }
   0x8   : > { %v208_v27 = vand.u32 (!%p145_p3), 127, %v207_v26  ;;  %195 = vst.msk [vmem:[#allocation2] sm:$0xff] (!%p145_p3), %vm194_vm5, %v489_v47  ;;  %196 = vst.msk [vmem:[#allocation2 + $0x8] sm:$0xff] (!%p145_p3), %vm194_vm5, %v489_v47 }
   0x9   : > { %197 = vst.msk [vmem:[#allocation2 + $0x10] sm:$0xff] (!%p145_p3), %vm194_vm5, %v489_v47  ;;  %198 = vst.msk [vmem:[#allocation2 + $0x18] sm:$0xff] (!%p145_p3), %vm194_vm5, %v489_v47 }
   0xe   : > { %s615_s13 = smov (!%p173_p4, %s412_s13), 7  ;;  %s617_s9 = smov (!%p187_p5, %s478_s9), 1 }
   0xf   : > { %s413_s14 = sshll.u32 %s615_s13, 3  ;;  %v294_v59 = vld [vmem:[#allocation2] sm:$0xff]  ;;  %s189_s23 = scalar_lea.vmem %s609_s2, %s617_s9 }
  0x10   : > { %s184_s17 = scalar_lea.vmem %s608_s1, %s413_s14  ;;  %s176_s20 = scalar_lea.vmem %s607_s0, %s413_s14 }
  0x11   : > { %v199_v1 = vld [vmem:[%s184_s17] sm:$0xff]  ;;  %v201_v2 = vld [vmem:[%s184_s17 + $0x10] sm:$0xff]  ;;  %v200_v3 = vld [vmem:[%s184_s17 + $0x8] sm:$0xff] }
  0x12   : > { %v242_v4 = vsel %vm229_vm0, %v199_v1, -inf  ;;  %v248_v5 = vsel %vm229_vm0, %v201_v2, -inf  ;;  %v531_v6 = vld [vmem:[%s184_s17 + $0x18] sm:$0xff]  ;;  %v245_v7 = vsel %vm229_vm0, %v200_v3, -inf  ;;  %v539_v9 = vld [vmem:[%s176_s20 + $0x8] sm:$0xff]  ;;  %v542_v10 = vld [vmem:[%s176_s20 + $0x10] sm:$0xff] }
  0x13   : > { %243 = vmax.xlane.f32.xlu0 %v242_v4  ;;  %249 = vmax.xlane.f32.xlu1 %v248_v5  ;;  %v251_v8 = vsel %vm229_vm0, %v531_v6, -inf  ;;  %v544_v11 = vld [vmem:[%s176_s20] sm:$0xff]  ;;  %v548_v12 = vld [vmem:[%s176_s20 + $0x18] sm:$0xff]  ;;  %vm292_vm7 = vcmp.ge.s32.totalorder %v542_v10, 0  ;;  %vm291_vm8 = vcmp.ge.s32.totalorder %v539_v9, 0 }
  0x14   : > { %vm290_vm6 = vcmp.ge.s32.totalorder %v544_v11, 0  ;;  %vm293_vm9 = vcmp.ge.s32.totalorder %v548_v12, 0 }
  0x17   : > { %246 = vmax.xlane.f32.xlu0 %v245_v7  ;;  %252 = vmax.xlane.f32.xlu1 %v251_v8  ;;  %v295_v8 = vld [vmem:[#allocation2 + $0x8] sm:$0xff] }
  0x28   : > { %213 = vperm.xlu1 %447, %v539_v9  }
  0x2c   : > { %216 = vperm.xlu1 %447, %v542_v10  }
  0x2d   : > { %210 = vperm.xlu0 %446, %v544_v11  }
  0x30   : > { %219 = vperm.xlu1 %447, %v548_v12  }
  0xa0   : > { %v551_v13 = vpop.xlane.xlu0 %243  ;;  %v553_v14 = vpop.xlane.xlu1 %249 }
  0xa1   : > { %v254_v15 = vsub.f32 %v199_v1, %v551_v13  ;;  %v256_v16 = vsub.f32 %v201_v2, %v553_v14 }
  0xa3   : > { %v258_v17 = vmul.f32 1.442695, %v254_v15  ;;  %v262_v18 = vmul.f32 1.442695, %v256_v16 }
  0xa4   : > { %v557_v19 = vpop.xlane.xlu0 %246  ;;  %v559_v20 = vpop.xlane.xlu1 %252 }
  0xa5   : > { %448 = vpow2.f32 %v258_v17  ;;  %v255_v21 = vsub.f32 %v200_v3, %v557_v19  ;;  %v257_v22 = vsub.f32 %v531_v6, %v559_v20 }
  0xa6   : > { %450 = vpow2.f32 %v262_v18  ;;  %v297_v18 = vld [vmem:[#allocation2 + $0x18] sm:$0xff] }
  0xa7   : > { %v260_v23 = vmul.f32 1.442695, %v255_v21  ;;  %v264_v24 = vmul.f32 1.442695, %v257_v22 }
  0xa8   : > { %v214_v25 = vpop.permute.xlu1 %213 }
  0xa9   : > { %452 = vpow2.f32 %v260_v23  ;;  %vm222_vm3 = vcmp.eq.s32.totalorder %v208_v27, %v214_v25 }
  0xaa   : > { %454 = vpow2.f32 %v264_v24  ;;  %v226_v43 = vsel %vm222_vm3, %v200_v3, 0.0 }
  0xab   : > { %v233_v44 = vsel %vm229_vm0, %v226_v43, 0.0 }
  0xac   : > { %v217_v29 = vpop.permute.xlu1 %216  ;;  %v211_v32 = vpop.permute.xlu0 %210 }
  0xad   : > { %vm223_vm1 = vcmp.eq.s32.totalorder %v208_v27, %v217_v29  ;;  %vm221_vm2 = vcmp.eq.s32.totalorder %v208_v27, %v211_v32 }
  0xae   : > { %v227_v35 = vsel %vm223_vm1, %v201_v2, 0.0  ;;  %v225_v40 = vsel %vm221_vm2, %v199_v1, 0.0 }
  0xaf   : > { %v449_v28 = vpop.eup %448  ;;  %v236_v39 = vsel %vm229_vm0, %v227_v35, 0.0  ;;  %v230_v41 = vsel %vm229_vm0, %v225_v40, 0.0 }
  0xb0   : > { %v451_v30 = vpop.eup %450  ;;  %v266_v31 = vsel %vm229_vm0, %v449_v28, 0.0  ;;  %v220_v42 = vpop.permute.xlu1 %219 }
  0xb1   : > { %267 = vadd.xlane.f32.xlu1 %v266_v31  ;;  %v272_v33 = vsel %vm229_vm0, %v451_v30, 0.0  ;;  %vm224_vm4 = vcmp.eq.s32.totalorder %v208_v27, %v220_v42 }
  0xb2   : > { %v228_v45 = vsel %vm224_vm4, %v531_v6, 0.0  ;;  %v296_v6 = vld [vmem:[#allocation2 + $0x10] sm:$0xff] }
  0xb3   : > { %v453_v34 = vpop.eup %452  ;;  %v239_v46 = vsel %vm229_vm0, %v228_v45, 0.0 }
  0xb4   : > { %v455_v36 = vpop.eup %454  ;;  %v269_v37 = vsel %vm229_vm0, %v453_v34, 0.0 }
  0xb5   : > { %273 = vadd.xlane.f32.xlu1 %v272_v33  ;;  %270 = vadd.xlane.f32.xlu0 %v269_v37  ;;  %v275_v38 = vsel %vm229_vm0, %v455_v36, 0.0 }
  0xb9   : > { %276 = vadd.xlane.f32.xlu1 %v275_v38  ;;  %237 = vadd.xlane.f32.xlu0 %v236_v39 }
  0xbd   : > { %231 = vadd.xlane.f32.xlu1 %v230_v41 }
  0xc1   : > { %234 = vadd.xlane.f32.xlu1 %v233_v44 }
  0xc5   : > { %240 = vadd.xlane.f32.xlu1 %v239_v46 }
 0x13e   : > { %v268_v48 = vpop.xlane.xlu1 %267 }
 0x13f   : > { %456 = vlog2.f32 %v268_v48 }
 0x142   : > { %v274_v49 = vpop.xlane.xlu1 %273  ;;  %v271_v50 = vpop.xlane.xlu0 %270 }
 0x143   : > { %458 = vlog2.f32 %v274_v49 }
 0x144   : > { %460 = vlog2.f32 %v271_v50 }
 0x146   : > { %v277_v51 = vpop.xlane.xlu1 %276  ;;  %v238_v3 = vpop.xlane.xlu0 %237 }
 0x147   : > { %462 = vlog2.f32 %v277_v51 }
 0x149   : > { %v457_v52 = vpop.eup %456 }
 0x14a   : > { %v279_v53 = vmul.f32 0.6931472, %v457_v52  ;;  %v232_v54 = vpop.xlane.xlu1 %231 }
 0x14c   : > { %v286_v55 = vadd.f32 %v279_v53, %v551_v13 }
 0x14d   : > { %v459_v56 = vpop.eup %458 }
 0x14e   : > { %v461_v57 = vpop.eup %460  ;;  %v283_v58 = vmul.f32 0.6931472, %v459_v56  ;;  %v298_v60 = vsub.f32 %v286_v55, %v232_v54  ;;  %v235_v62 = vpop.xlane.xlu1 %234 }
 0x14f   : > { %v281_v61 = vmul.f32 0.6931472, %v461_v57 }
 0x150   : > { %v302_v63 = vsel %vm290_vm6, %v298_v60, 0.0  ;;  %v288_v0 = vadd.f32 %v283_v58, %v553_v14 }
 0x151   : > { %v463_v1 = vpop.eup %462  ;;  %v306_v2 = vadd.f32 %v302_v63, %v294_v59  ;;  %v287_v4 = vadd.f32 %v281_v61, %v557_v19 }
 0x152   : > { %v285_v5 = vmul.f32 0.6931472, %v463_v1  ;;  %v300_v7 = vsub.f32 %v288_v0, %v238_v3  ;;  %v241_v16 = vpop.xlane.xlu1 %240 }
 0x153   : > { %311 = vst.msk [vmem:[#allocation2] sm:$0xff] %vm194_vm5, %v306_v2  ;;  %v299_v11 = vsub.f32 %v287_v4, %v235_v62 }
 0x154   : > { %v304_v13 = vsel %vm292_vm7, %v300_v7, 0.0  ;;  %v289_v15 = vadd.f32 %v285_v5, %v559_v20 }
 0x155   : > { %v308_v14 = vadd.f32 %v304_v13, %v296_v6  ;;  %v303_v10 = vsel %vm291_vm8, %v299_v11, 0.0 }
 0x156   : > { %v307_v17 = vadd.f32 %v303_v10, %v295_v8  ;;  %v301_v19 = vsub.f32 %v289_v15, %v241_v16 }
 0x157   : > { %313 = vst.msk [vmem:[#allocation2 + $0x10] sm:$0xff] %vm194_vm5, %v308_v14 }
 0x158   : > { %312 = vst.msk [vmem:[#allocation2 + $0x8] sm:$0xff] %vm194_vm5, %v307_v17  ;;  %v305_v9 = vsel %vm293_vm9, %v301_v19, 0.0 }
 0x159   : > { %v309_v21 = vadd.f32 %v305_v9, %v297_v18 }
 0x15a   : > { %v318_v22 = vld [vmem:[#allocation2] sm:$0xff] }
 0x15b   : > { %314 = vst.msk [vmem:[#allocation2 + $0x18] sm:$0xff] %vm194_vm5, %v309_v21  ;;  %v322_v20 = vsel %vm194_vm5, %v318_v22, 0.0 }
 0x15e   : > { %v320_v24 = vld [vmem:[#allocation2 + $0x10] sm:$0xff] }
 0x15f   : > { %v319_v23 = vld [vmem:[#allocation2 + $0x8] sm:$0xff]  ;;  %v325_v27 = vsel %vm194_vm5, %v320_v24, 0.0 }
 0x160   : > { %v323_v12 = vsel %vm194_vm5, %v319_v23, 0.0 }
 0x161   : > { %v324_v25 = vadd.f32 %v323_v12, %v322_v20 }
 0x162   : > { %v321_v26 = vld [vmem:[#allocation2 + $0x18] sm:$0xff] }
 0x163   : > { %v326_v28 = vadd.f32 %v325_v27, %v324_v25  ;;  %v327_v29 = vsel %vm194_vm5, %v321_v26, 0.0 }
 0x165   : > { %v328_v30 = vadd.f32 %v327_v29, %v326_v28 }
 0x167   : > { %329 = vadd.xlane.f32.xlu0 %v328_v30 }
 0x1f4   : > { %v330_v31 = vpop.xlane.xlu0 %329 }
 0x1f5   : > { %v331_v32 = vrot.slane %v330_v31, 4 }
 0x1f7   : > { %v332_v33 = vadd.f32 %v331_v32, %v330_v31 }
 0x1f9   : > { %v333_v34 = vrot.slane %v332_v33, 2 }
 0x1fb   : > { %v334_v35 = vadd.f32 %v333_v34, %v332_v33 }
 0x1fd   : > { %v335_v36 = vrot.slane %v334_v35, 1 }
 0x1ff   : > { %v336_v37 = vadd.f32 %v335_v36, %v334_v35 }
 0x201   : > { %418 = vpush %v336_v37 }
 0x232   : > { %s419_s24 = spop %418 }
 0x233   : > { %v338_v38 = vstv %s419_s24 }
 0x234   : > { %339 = vst [vmem:[%s189_s23] sm:$0x1] %v338_v38 }
 0x235 PF: > { %s12_s11 = sadd.s32 1, %s486_s11   ;;  %s610_s9 = smov %s482_s10 }
 0x236   : > { %p9_p6 = scmp.ge.s32.totalorder %s12_s11, 4   ;;  %s611_s10 = smov %s613_s12 }
 0x238   :  { %11 = sbr.rel (!%p9_p6) target bundleno = 2 (0x2), region = 69 }

</bundles_post_ra>
